<compile_context>
chip_gen: v7x
topology: tpu7x:2x2x1
jax: 0.10.0
libtpu: 0.0.40
codegen_flags: <defaults>
</compile_context>

<pallas_src>
import jax
import jax.numpy as jnp
from jax.experimental import pallas as pl
from jax.experimental.pallas import tpu as pltpu

MARGIN = 5.0
_NEG_INF = -1e30
_LANES = 128


def _round_up(x, m):
    return (x + m - 1) // m * m


def _choose_tile(size, pref, align):
    """Tile size (multiple of `align`, <= pref when possible) + padded extent."""
    if size <= pref:
        t = _round_up(size, align)
        return t, t
    return pref, _round_up(size, pref)


def _pretext_loss_kernel(c_ref, asq_ref, a_ref, nt_ref, out_ref, cross_ref):
    """Grid = (i anchor tile [parallel], j negative tile, k feature tile [last]).

    c_ref:     [1, TJ]   margin + pos[j] - ||n_j||^2 (f32; padded cols = -1e30).
    asq_ref:   [TI, 1]   ||a_i||^2 (f32).
    a_ref:     [TI, TD]  anchor tile (bf16 or f32).
    nt_ref:    [TD, TJ]  pre-transposed negative tile (bf16 or f32).
    out_ref:   [TI, 128] lane-dense row-sum accumulator (f32; resident across j,k).
    cross_ref: [TI, TJ]  f32 VMEM scratch accumulating a.n over k.
    """
    j = pl.program_id(1)
    k = pl.program_id(2)

    @pl.when(jnp.logical_and(j == 0, k == 0))
    def _():
        out_ref[...] = jnp.zeros_like(out_ref)

    @pl.when(k == 0)
    def _():
        cross_ref[...] = jnp.zeros_like(cross_ref)

    # Partial inner products on the MXU: [TI, TD] x [TD, TJ], accumulated over k.
    cross_ref[...] += jnp.dot(a_ref[...], nt_ref[...],
                              preferred_element_type=jnp.float32)

    @pl.when(k == pl.num_programs(2) - 1)
    def _():
        # hinge(i,j) = max(0, margin + pos[j] - ||a_i - n_j||^2)
        #            = max(0, c[j] - ||a_i||^2 + 2 * a_i . n_j)
        clamped = jnp.maximum(
            c_ref[...] - asq_ref[...] + 2.0 * cross_ref[...], 0.0)   # [TI, TJ]
        tj = clamped.shape[1]
        # Lane-dense partial row sums: fold TJ lanes into 128 with static
        # lane-aligned slices + VPU adds (no XLU cross-lane reduction here).
        partial = clamped[:, :_LANES]
        for g in range(1, tj // _LANES):
            partial = partial + clamped[:, g * _LANES:(g + 1) * _LANES]
        out_ref[...] += partial


def pretext_loss(features, *, bs, temperature,
                 tile_i=512, tile_j=256, tile_d=1024,
                 operand_dtype=jnp.bfloat16):
    """features: [3*bs, dim]. Returns scalar loss (float32)."""
    three_b, dim = features.shape
    assert three_b == 3 * bs, f"expected leading dim {3 * bs}, got {three_b}"

    features = features.astype(jnp.float32)
    anchor = features[:bs]
    positive = features[bs:2 * bs]
    negative = features[2 * bs:3 * bs]

    # --- O(bs*dim) prologue in plain JAX (f32), hoisted out of the pairwise loop ---
    pos = jnp.sum((anchor - positive) ** 2, axis=-1) / temperature   # [bs]
    asq = jnp.sum(anchor * anchor, axis=-1)                          # [bs]
    nsq = jnp.sum(negative * negative, axis=-1)                      # [bs]
    c = MARGIN + pos - nsq                                           # [bs]

    # --- tiling / padding (lane aligned) ---
    ti, bs_i = _choose_tile(bs, tile_i, 8)       # anchor (sublane) axis
    tj, bs_j = _choose_tile(bs, tile_j, 128)     # negative (lane) axis
    td, d_pad = _choose_tile(dim, tile_d, 128)   # feature (contraction) axis

    a_pad = jnp.pad(anchor, ((0, bs_i - bs), (0, d_pad - dim))).astype(operand_dtype)
    # Pre-transpose negatives once (O(bs*dim)) so the MXU gets [TI,TD] x [TD,TJ]
    # with no per-step in-kernel transpose.
    n_t = jnp.pad(negative, ((0, bs_j - bs), (0, d_pad - dim))
                  ).T.astype(operand_dtype)                          # [d_pad, bs_j]
    asq_col = jnp.pad(asq, (0, bs_i - bs)).reshape(bs_i, 1).astype(jnp.float32)
    # Padded columns get a huge negative "c" so margin + pos - neg clamps to 0.
    c_row = jnp.pad(c, (0, bs_j - bs),
                    constant_values=_NEG_INF).reshape(1, bs_j).astype(jnp.float32)

    grid = (bs_i // ti, bs_j // tj, d_pad // td)

    itemsize = jnp.dtype(operand_dtype).itemsize
    cost = pl.CostEstimate(
        flops=2 * bs_i * bs_j * d_pad,
        transcendentals=0,
        bytes_accessed=(bs_i * d_pad * itemsize
                        + (bs_i // ti) * d_pad * bs_j * itemsize
                        + bs_i * _LANES * 4))

    out = pl.pallas_call(
        _pretext_loss_kernel,
        out_shape=jax.ShapeDtypeStruct((bs_i, _LANES), jnp.float32),
        grid_spec=pltpu.PrefetchScalarGridSpec(
            num_scalar_prefetch=0,
            grid=grid,
            in_specs=[
                pl.BlockSpec((1, tj), lambda i, j, k: (0, j)),     # c[j]
                pl.BlockSpec((ti, 1), lambda i, j, k: (i, 0)),     # ||a_i||^2
                pl.BlockSpec((ti, td), lambda i, j, k: (i, k)),    # anchor tile
                pl.BlockSpec((td, tj), lambda i, j, k: (k, j)),    # negative^T tile
            ],
            out_specs=pl.BlockSpec((ti, _LANES), lambda i, j, k: (i, 0)),
            scratch_shapes=[pltpu.VMEM((ti, tj), jnp.float32)],
        ),
        compiler_params=pltpu.CompilerParams(
            dimension_semantics=("parallel", "arbitrary", "arbitrary"),
            vmem_limit_bytes=32 * 1024 * 1024),
        cost_estimate=cost,
    )(c_row, asq_col, a_pad, n_t)

    # Drop padded anchor rows, reduce the 128 partial lanes, then mean.
    return jnp.sum(out[:bs]) / bs


def pretext_loss_ref(features, *, bs, temperature):
    """Pure-JAX reference mirroring the PyTorch forward exactly."""
    a = features[:bs]
    p = features[bs:2 * bs]
    n = features[2 * bs:3 * bs]
    pos = jnp.sum((a - p) ** 2, axis=-1) / temperature             # [bs]
    neg = jnp.sum((a[:, None, :] - n) ** 2, axis=2)                # [bs, bs]
    clamped = jnp.maximum(MARGIN + pos - neg, 0.0)                 # pos -> columns
    return jnp.mean(jnp.sum(clamped, axis=1))


# TODO(synk): cosine_similarity / euclidan_dist helpers on the module are unused
# by forward() and are not translated.

if __name__ == "__main__":
    bs = 8
    dim = 32
    temperature = 0.5

    key = jax.random.PRNGKey(0)
    # Module input: [3*bs, dim] stacked (original, positive, subsequence) views.
    features = jax.random.normal(key, (3 * bs, dim), dtype=jnp.float32)

    ref = jax.block_until_ready(
        pretext_loss_ref(features, bs=bs, temperature=temperature))

    # f32 operands: should match the direct-difference reference tightly.
    loss_f32 = jax.block_until_ready(
        pretext_loss(features, bs=bs, temperature=temperature,
                     operand_dtype=jnp.float32))
    if not bool(jnp.allclose(loss_f32, ref, rtol=1e-5, atol=1e-3)):
        raise AssertionError(f"f32 mismatch: pallas={loss_f32} ref={ref}")

    # bf16 MXU operands (default fast path): looser tolerance from input rounding.
    loss_bf16 = jax.block_until_ready(
        pretext_loss(features, bs=bs, temperature=temperature))
    if not bool(jnp.allclose(loss_bf16, ref, rtol=1e-2, atol=0.5)):
        raise AssertionError(f"bf16 mismatch: pallas={loss_bf16} ref={ref}")

    print("KERNEL_OK")
</pallas_src>

<mosaic_0001>
module attributes {stable_mosaic.version = 11 : i64} {
  func.func @_pretext_loss_kernel(%arg0: i32, %arg1: i32, %arg2: i32, %arg3: memref<1x128xf32, #tpu.memory_space<vmem>>, %arg4: memref<8x1xf32, #tpu.memory_space<vmem>>, %arg5: memref<8x128xf32, #tpu.memory_space<vmem>>, %arg6: memref<128x128xf32, #tpu.memory_space<vmem>>, %arg7: memref<8x128xf32, #tpu.memory_space<vmem>>, %arg8: memref<8x128xf32, #tpu.memory_space<vmem>>) attributes {dimension_semantics = [#tpu.dimension_semantics<parallel>, #tpu.dimension_semantics<arbitrary>, #tpu.dimension_semantics<arbitrary>], iteration_bounds = array<i64: 1, 1, 1>, scalar_prefetch = 0 : i64, scratch_operands = 1 : i64, tpu.core_type = #tpu.core_type<tc>, window_params = [{transform_indices = @transform_0, window_bounds = array<i64: 1, 128>}, {transform_indices = @transform_1, window_bounds = array<i64: 8, 1>}, {transform_indices = @transform_2, window_bounds = array<i64: 8, 128>}, {transform_indices = @transform_3, window_bounds = array<i64: 128, 128>}, {transform_indices = @transform_4, window_bounds = array<i64: 8, 128>}]} {
    %c0_i32 = arith.constant 0 : i32
    %0 = arith.cmpi eq, %arg1, %c0_i32 : i32
    %c0_i32_0 = arith.constant 0 : i32
    %1 = arith.cmpi eq, %arg2, %c0_i32_0 : i32
    %2 = arith.andi %0, %1 : i1
    %3 = arith.extui %2 : i1 to i32
    %c0_i32_1 = arith.constant 0 : i32
    %4 = arith.cmpi ne, %3, %c0_i32_1 : i32
    scf.if %4 {
      %cst_13 = arith.constant 0.000000e+00 : f32
      %17 = vector.broadcast %cst_13 : f32 to vector<8x128xf32>
      %c0_14 = arith.constant 0 : index
      %c0_15 = arith.constant 0 : index
      %18 = vector.load %arg7[%c0_14, %c0_15] : memref<8x128xf32, #tpu.memory_space<vmem>>, vector<8x128xf32>
      tpu.vector_store %arg7[%c0_14, %c0_15], %17 {strides = array<i32>} : memref<8x128xf32, #tpu.memory_space<vmem>>, vector<8x128xf32>,
    } else {
    }
    %c0_i32_2 = arith.constant 0 : i32
    %5 = arith.cmpi eq, %arg2, %c0_i32_2 : i32
    %6 = arith.extui %5 : i1 to i32
    %c0_i32_3 = arith.constant 0 : i32
    %7 = arith.cmpi ne, %6, %c0_i32_3 : i32
    scf.if %7 {
      %cst_13 = arith.constant 0.000000e+00 : f32
      %17 = vector.broadcast %cst_13 : f32 to vector<8x128xf32>
      %c0_14 = arith.constant 0 : index
      %c0_15 = arith.constant 0 : index
      %18 = vector.load %arg8[%c0_14, %c0_15] : memref<8x128xf32, #tpu.memory_space<vmem>>, vector<8x128xf32>
      tpu.vector_store %arg8[%c0_14, %c0_15], %17 {strides = array<i32>} : memref<8x128xf32, #tpu.memory_space<vmem>>, vector<8x128xf32>,
    } else {
    }
    %c0 = arith.constant 0 : index
    %c0_4 = arith.constant 0 : index
    %8 = vector.load %arg8[%c0, %c0_4] : memref<8x128xf32, #tpu.memory_space<vmem>>, vector<8x128xf32>
    %c0_5 = arith.constant 0 : index
    %c0_6 = arith.constant 0 : index
    %9 = vector.load %arg5[%c0_5, %c0_6] : memref<8x128xf32, #tpu.memory_space<vmem>>, vector<8x128xf32>
    %c0_7 = arith.constant 0 : index
    %c0_8 = arith.constant 0 : index
    %10 = vector.load %arg6[%c0_7, %c0_8] : memref<128x128xf32, #tpu.memory_space<vmem>>, vector<128x128xf32>
    %cst = arith.constant dense<0.000000e+00> : vector<8x128xf32>
    %11 = tpu.matmul %9, %10, %cst {dimension_numbers = #tpu.dot_dimension_numbers<[1], [0], [0], [1], [0, 0, 1, 1], [], []>} : vector<8x128xf32>, vector<128x128xf32>, vector<8x128xf32> -> vector<8x128xf32>
    %12 = arith.addf %8, %11 : vector<8x128xf32>
    %c0_9 = arith.constant 0 : index
    %c0_10 = arith.constant 0 : index
    %13 = vector.load %arg8[%c0_9, %c0_10] : memref<8x128xf32, #tpu.memory_space<vmem>>, vector<8x128xf32>
    tpu.vector_store %arg8[%c0_9, %c0_10], %12 {strides = array<i32>} : memref<8x128xf32, #tpu.memory_space<vmem>>, vector<8x128xf32>,
    %c0_i32_11 = arith.constant 0 : i32
    %14 = arith.cmpi eq, %arg2, %c0_i32_11 : i32
    %15 = arith.extui %14 : i1 to i32
    %c0_i32_12 = arith.constant 0 : i32
    %16 = arith.cmpi ne, %15, %c0_i32_12 : i32
    scf.if %16 {
      %c0_13 = arith.constant 0 : index
      %c0_14 = arith.constant 0 : index
      %17 = vector.load %arg3[%c0_13, %c0_14] : memref<1x128xf32, #tpu.memory_space<vmem>>, vector<1x128xf32>
      %c0_15 = arith.constant 0 : index
      %c0_16 = arith.constant 0 : index
      %18 = vector.load %arg4[%c0_15, %c0_16] : memref<8x1xf32, #tpu.memory_space<vmem>>, vector<8x1xf32>
      %19 = vector.broadcast %17 : vector<1x128xf32> to vector<8x128xf32>
      %20 = vector.broadcast %18 : vector<8x1xf32> to vector<8x128xf32>
      %21 = arith.subf %19, %20 : vector<8x128xf32>
      %c0_17 = arith.constant 0 : index
      %c0_18 = arith.constant 0 : index
      %22 = vector.load %arg8[%c0_17, %c0_18] : memref<8x128xf32, #tpu.memory_space<vmem>>, vector<8x128xf32>
      %cst_19 = arith.constant 2.000000e+00 : f32
      %23 = vector.broadcast %cst_19 : f32 to vector<8x128xf32>
      %24 = arith.mulf %23, %22 : vector<8x128xf32>
      %25 = arith.addf %21, %24 : vector<8x128xf32>
      %cst_20 = arith.constant 0.000000e+00 : f32
      %26 = vector.broadcast %cst_20 : f32 to vector<8x128xf32>
      %27 = arith.maximumf %25, %26 : vector<8x128xf32>
      %c0_21 = arith.constant 0 : index
      %c0_22 = arith.constant 0 : index
      %28 = vector.load %arg7[%c0_21, %c0_22] : memref<8x128xf32, #tpu.memory_space<vmem>>, vector<8x128xf32>
      %29 = arith.addf %28, %27 : vector<8x128xf32>
      %c0_23 = arith.constant 0 : index
      %c0_24 = arith.constant 0 : index
      %30 = vector.load %arg7[%c0_23, %c0_24] : memref<8x128xf32, #tpu.memory_space<vmem>>, vector<8x128xf32>
      tpu.vector_store %arg7[%c0_23, %c0_24], %29 {strides = array<i32>} : memref<8x128xf32, #tpu.memory_space<vmem>>, vector<8x128xf32>,
    } else {
    }
    return
  }
  func.func @transform_0(%arg0: i32, %arg1: i32, %arg2: i32) -> (i32, i32) {
    %c0_i32 = arith.constant 0 : i32
    %c0_i32_0 = arith.constant 0 : i32
    return %c0_i32, %arg1 : i32, i32
  }
  func.func @transform_1(%arg0: i32, %arg1: i32, %arg2: i32) -> (i32, i32) {
    %c0_i32 = arith.constant 0 : i32
    %c0_i32_0 = arith.constant 0 : i32
    return %arg0, %c0_i32 : i32, i32
  }
  func.func @transform_2(%arg0: i32, %arg1: i32, %arg2: i32) -> (i32, i32) {
    %c0_i32 = arith.constant 0 : i32
    return %arg0, %arg2 : i32, i32
  }
  func.func @transform_3(%arg0: i32, %arg1: i32, %arg2: i32) -> (i32, i32) {
    %c0_i32 = arith.constant 0 : i32
    return %arg2, %arg1 : i32, i32
  }
  func.func @transform_4(%arg0: i32, %arg1: i32, %arg2: i32) -> (i32, i32) {
    %c0_i32 = arith.constant 0 : i32
    %c0_i32_0 = arith.constant 0 : i32
    return %arg0, %c0_i32 : i32, i32
  }
}

</mosaic_0001>

<bundles_post_ra>
// kernel: tpu_custom_call.1
= control target key start
LH: loop header
LB: loop body
LE: loop exit
PB: predicated region body
PF: predicated region fallthrough
CT: control target
= control target key end

     0   :  { %9 = vsyncpa [#allocation4], 0  ;;  %s372_s0 = inlined_call_operand.vmem [shape: f32[1,128], index: 0, kind: input, shape index: {}]   ;;  %s373_s1 = inlined_call_operand.vmem [shape: f32[8,1], index: 1, kind: input, shape index: {}]   ;;  %s374_s2 = inlined_call_operand.vmem [shape: f32[8,128], index: 2, kind: input, shape index: {}]   ;;  %s375_s3 = inlined_call_operand.hbm [shape: f32[128,128], index: 3, kind: input, shape index: {}]   ;;  %s376_s4 = inlined_call_operand.hbm [shape: f32[8,128], index: 4, kind: output, shape index: {}]  }
   0x1   :  { %10 = vsyncpa [#allocation5], 0  ;;  %s306_s15 = smov [#allocation3]   ;;  %s258_s19 = scalar_lea.hbm %s375_s3, 2048 }
   0x2   :  { %s22_s16 = sshll.u32 %s306_s15, 4  ;;  %p259_p0 = scmp.ne.s32.totalorder %s375_s3, %s258_s19  ;;  %s23_s16 = int_to_ptr.vmem [resolvable:$true] %s22_s16 }
   0x3   :  { %p262_p1 = scmp.lt.u32.totalorder %s258_s19, %s375_s3 }
   0x5   :  { %p264_p2 = pnand %p262_p1, %p259_p0 }
   0x7   :  { %267 = shalt.err (!%p264_p2)
}
   0x8   :  { %s268_s24 = scalar_lea.vmem %s23_s16, 2048  ;;  %p273_p4 = scmp.lt.s32.totalorder %s23_s16, %s23_s16 }
   0x9   :  { %p269_p3 = scmp.ne.s32.totalorder %s23_s16, %s268_s24  ;;  %p274_p5 = scmp.lt.s32.totalorder %s268_s24, %s268_s24 }
   0xb   :  { %p275_p6 = por %p274_p5, %p273_p4 }
   0xd   :  { %p276_p7 = pnand %p275_p6, %p269_p3 }
   0xf   :  { %279 = shalt.err (!%p276_p7)
}
  0x10   :  { %s307_s25 = smov 128   ;;  %s308_s26 = smov 8  }
  0x11   :  { %28 = dma.hbm_to_vmem [thread:$0]  %s375_s3, 2048, %s23_s16, [#allocation4], %s307_s25, %s307_s25, %s308_s26  }
  0x12   :  { %302 = dma.done.wait [#allocation4], 2048  }
  0x13   :  { %303 = vsyncadd [#allocation4], 4294965248  ;;  %v309_v0 = vmov 0.0|0.0   ;;  %vm310_vm0 = vmmov 0   ;;  %v311_v1 = vmov 0.0   ;;  %v312_v2 = vmov 0  }
  0x14   :  { %225 = vmatprep.subr.bf16.mxu0 %v309_v0  ;;  %222 = vmatprep.mubr.msk.f32.mxu0 %vm310_vm0, %v311_v1  ;;  %v45_v3 = vld [vmem:[#allocation3] sm:$0xff]  ;;  %v46_v4 = vld [vmem:[#allocation3 + $0x8] sm:$0xff]  ;;  %v47_v5 = vld [vmem:[#allocation3 + $0x10] sm:$0xff]  ;;  %s313_s7 = smov [#allocation6]  }
  0x15   :  { %257 = vset.pattern.permute.xlu0 %v312_v2  ;;  %v226_v6 = vpack.c.bf16 %v46_v4, %v45_v3  ;;  %v48_v7 = vld [vmem:[#allocation3 + $0x18] sm:$0xff]  ;;  %v49_v9 = vld [vmem:[#allocation3 + $0x20] sm:$0xff]  ;;  %v50_v10 = vld [vmem:[#allocation3 + $0x28] sm:$0xff]  ;;  %s163_s8 = sshll.u32 %s313_s7, 4  ;;  %s164_s8 = int_to_ptr.vmem [resolvable:$true] %s163_s8 }
  0x16   :  { %v229_v8 = vpack.c.bf16 %v48_v7, %v47_v5  ;;  %v137_v11 = vld [vmem:[%s373_s1] sm:$0xff]  ;;  %v232_v12 = vpack.c.bf16 %v50_v10, %v49_v9  ;;  %v51_v13 = vld [vmem:[#allocation3 + $0x30] sm:$0xff]  ;;  %v52_v14 = vld [vmem:[#allocation3 + $0x38] sm:$0xff]  ;;  %s280_s9 = scalar_lea.vmem %s164_s8, 128  ;;  %p285_p9 = scmp.lt.s32.totalorder %s164_s8, %s164_s8 }
  0x17   :  { %227 = vmatpush3.bf16.msra.mxu0 %v226_v6  ;;  %146 = vperm.xlu0 %257, %v137_v11   ;;  %v235_v15 = vpack.c.bf16 %v52_v14, %v51_v13  ;;  %v53_v16 = vld [vmem:[#allocation3 + $0x40] sm:$0xff]  ;;  %v54_v17 = vld [vmem:[#allocation3 + $0x48] sm:$0xff]  ;;  %v55_v19 = vld [vmem:[#allocation3 + $0x50] sm:$0xff]  ;;  %p281_p8 = scmp.ne.s32.totalorder %s164_s8, %s280_s9  ;;  %p286_p10 = scmp.lt.s32.totalorder %s280_s9, %s280_s9 }
  0x18   :  { %228 = vmatprep.subr.bf16.mxu0 %v309_v0  ;;  %v238_v18 = vpack.c.bf16 %v54_v17, %v53_v16  ;;  %v56_v20 = vld [vmem:[#allocation3 + $0x58] sm:$0xff]  ;;  %v57_v22 = vld [vmem:[#allocation3 + $0x60] sm:$0xff]  ;;  %v58_v23 = vld [vmem:[#allocation3 + $0x68] sm:$0xff] }
  0x19   :  { %v241_v21 = vpack.c.bf16 %v56_v20, %v55_v19  ;;  %v244_v24 = vpack.c.bf16 %v58_v23, %v57_v22  ;;  %v59_v25 = vld [vmem:[#allocation3 + $0x70] sm:$0xff]  ;;  %v60_v26 = vld [vmem:[#allocation3 + $0x78] sm:$0xff]  ;;  %v44_v28 = vld [vmem:[%s374_s2] sm:$0xff]  ;;  %p287_p11 = por %p286_p10, %p285_p9 }
  0x1a   :  { %v247_v27 = vpack.c.bf16 %v60_v26, %v59_v25  ;;  %v172_v30 = vld [vmem:[%s372_s0] ss:$0 sm:$0xff] }
  0x1b   :  { %230 = vmatpush3.bf16.msra.mxu0 %v229_v8  ;;  %p288_p12 = pnand %p287_p11, %p281_p8 }
  0x1c   :  { %231 = vmatprep.subr.bf16.mxu0 %v309_v0 }
  0x1f   :  { %233 = vmatpush3.bf16.msra.mxu0 %v232_v12 }
  0x20   :  { %234 = vmatprep.subr.bf16.mxu0 %v309_v0 }
  0x23   :  { %236 = vmatpush3.bf16.msra.mxu0 %v235_v15 }
  0x24   :  { %237 = vmatprep.subr.bf16.mxu0 %v309_v0 }
  0x27   :  { %239 = vmatpush3.bf16.msra.mxu0 %v238_v18 }
  0x28   :  { %240 = vmatprep.subr.bf16.mxu0 %v309_v0 }
  0x2b   :  { %242 = vmatpush3.bf16.msra.mxu0 %v241_v21 }
  0x2c   :  { %243 = vmatprep.subr.bf16.mxu0 %v309_v0 }
  0x2f   :  { %245 = vmatpush3.bf16.msra.mxu0 %v244_v24 }
  0x30   :  { %246 = vmatprep.subr.bf16.mxu0 %v309_v0 }
  0x33   :  { %248 = vmatpush3.bf16.msra.mxu0 %v247_v27 }
  0x36   :  { %223 = vmatmul.mubr.f32.vlgmr.msra.gmra.mrb[0].mxu0 %v44_v28 }
  0x96   :  { %v147_v29 = vpop.permute.xlu0 %146 }
  0x97   :  { %v149_v31 = vsub.f32 %v172_v30, %v147_v29 }
 0x109   :  { %v127_v32 = vpop.f32.mrb[0].mxu0 }
 0x10a   :  { %v151_v33 = vmul.f32 2.0, %v127_v32  ;;  %v224_v34 = vpop.f32.mrb[1].mxu0 }
 0x10c   :  { %v152_v35 = vadd.f32 %v151_v33, %v149_v31 }
 0x10e   :  { %v153_v36 = vmax.f32 %v152_v35, 0.0 }
 0x110   :  { %156 = vst [vmem:[#allocation6] sm:$0xff] %v153_v36 }
 0x111   :  { %291 = shalt.err (!%p288_p12)
}
 0x112   :  { %s292_s0 = scalar_lea.hbm %s376_s4, 128 }
 0x113   :  { %p293_p13 = scmp.ne.s32.totalorder %s376_s4, %s292_s0  ;;  %p296_p0 = scmp.lt.u32.totalorder %s292_s0, %s376_s4 }
 0x115   :  { %p298_p1 = pnand %p296_p0, %p293_p13 }
 0x117   :  { %301 = shalt.err (!%p298_p1)
}
 0x118   :  { %166 = dma.vmem_to_hbm [thread:$0]  %s164_s8, 128, %s376_s4, [#allocation5]  }
 0x119   :  { %304 = dma.done.wait [#allocation5], 128  }
 0x11a   :  { %305 = vsyncadd [#allocation5], 4294967168 }
 0x11b   :  { %170 = vsyncpa [#allocation4], 1 }
 0x11c   :  { %171 = vsyncpa [#allocation5], 1 }

</bundles_post_ra>
